<compile_context>
chip_gen: v7x
topology: tpu7x:2x2x1
jax: 0.10.0
libtpu: 0.0.40
codegen_flags: <defaults>
</compile_context>

<pallas_src>
import functools

import jax
import jax.numpy as jnp
from jax import lax
from jax.experimental import pallas as pl
from jax.experimental.pallas import tpu as pltpu


# --------------------------------------------------------------------------
# Kernel
# --------------------------------------------------------------------------
def _attn_kernel(x_ref, wqkv_ref, bqkv_ref, wo_ref, bo_ref, o_ref,
                 qkv_sc, attn_sc, *, rp):
    """One grid step == `block_b` batch elements.

    x_ref:    (bt, S, E)    f32
    wqkv_ref: (E, 3*Rp)     bf16  (1/sqrt(R) scale folded into the Q columns)
    bqkv_ref: (1, 3*Rp)     f32
    wo_ref:   (Rp, E)       bf16
    bo_ref:   (1, E)        f32
    qkv_sc:   (bt, S, 3*Rp) bf16  VMEM scratch
    attn_sc:  (bt, S, Rp)   bf16  VMEM scratch
    """
    bt, S, E = x_ref.shape

    # ---- Fused QKV projection: a single bf16 MXU matmul over the flat slab.
    x2d = x_ref[...].reshape(bt * S, E).astype(jnp.bfloat16)
    qkv = jnp.dot(x2d, wqkv_ref[...],
                  preferred_element_type=jnp.float32) + bqkv_ref[...]
    qkv_sc[...] = qkv.reshape(bt, S, 3 * rp).astype(jnp.bfloat16)

    # ---- Attention core, one batch element at a time: bounds the (S, S)
    #      softmax intermediates to a single live copy regardless of bt.
    @pl.loop(0, bt)
    def _(b):
        row = qkv_sc[b]                        # (S, 3*Rp) bf16
        q = row[:, 0 * rp:1 * rp]              # scale already folded into W_q
        k = row[:, 1 * rp:2 * rp]
        v = row[:, 2 * rp:3 * rp]

        # QK^T: contract on the low-rank dim; no materialized transpose.
        scores = lax.dot_general(q, k, (((1,), (1,)), ((), ())),
                                 preferred_element_type=jnp.float32)  # (S, S)

        # Numerically stable softmax in f32; reciprocal on the idle EUP slot.
        m = jnp.max(scores, axis=-1, keepdims=True)
        e = jnp.exp(scores - m)
        denom = jnp.sum(e, axis=-1, keepdims=True)
        probs = (e * pl.reciprocal(denom, approx=True)).astype(jnp.bfloat16)

        # Dropout on probs: identity (eval mode).
        attn_sc[b] = lax.dot_general(probs, v, (((1,), (0,)), ((), ())),
                                     preferred_element_type=jnp.float32
                                     ).astype(jnp.bfloat16)

    # ---- Output projection over the flat slab (bf16 MXU, f32 accumulate). --
    out = jnp.dot(attn_sc[...].reshape(bt * S, rp), wo_ref[...],
                  preferred_element_type=jnp.float32) + bo_ref[...]
    o_ref[...] = out.reshape(bt, S, E).astype(o_ref.dtype)


# --------------------------------------------------------------------------
# Sizing helpers
# --------------------------------------------------------------------------
def _round_up(v, m):
    return ((v + m - 1) // m) * m


def _vmem_limit_bytes():
    """Generation-aware scoped-VMEM limit: be generous on 128 MiB chips
    (v5e/v6e), conservative on v7x (64 MiB physical) / unknown chips."""
    try:
        kind = jax.devices()[0].device_kind.lower()
    except Exception:
        kind = ""
    if "v5" in kind or "v6" in kind:
        return 100 << 20
    return 48 << 20


def _step_vmem_bytes(bt, S, E, Rp):
    """Estimate of per-grid-step VMEM use, including double-buffered blocks,
    scratch, and the dominant in-kernel f32 intermediates (S^2 terms)."""
    f32, bf16 = 4, 2
    m = bt * S
    x_blk = 2 * m * E * f32                       # double-buffered x tile
    o_blk = 2 * m * E * f32                       # double-buffered out tile
    weights = 2 * ((E * 3 * Rp + Rp * E) * bf16 + (3 * Rp + E) * f32)
    qkv_scr = m * 3 * Rp * bf16                   # scratch
    attn_scr = m * Rp * bf16                      # scratch
    qkv_val = m * 3 * Rp * f32                    # f32 accumulator before cast
    core = 3 * S * S * f32 + 3 * S * Rp * bf16    # one batch: scores/e/probs
    out_val = m * E * f32
    return x_blk + o_blk + weights + qkv_scr + attn_scr + qkv_val + core + out_val


def _choose_block_b(B, S, E, Rp, budget_bytes):
    """Largest batch tile that divides B and fits the VMEM budget, preferring
    (a) >= 2 grid steps (megacore / v7x TC balance), (b) an even number of
    steps, (c) a flattened MXU M-height bt*S >= 256, then the biggest bt."""
    divisors = [d for d in range(1, B + 1) if B % d == 0]
    fits = [d for d in divisors if _step_vmem_bytes(d, S, E, Rp) <= budget_bytes]
    if not fits:
        return 1

    def score(d):
        steps = B // d
        return (1 if steps >= 2 else 0,
                1 if steps % 2 == 0 else 0,
                1 if d * S >= 256 else 0,
                d)

    return max(fits, key=score)


# --------------------------------------------------------------------------
# One-time parameter preparation (hoisted out of the forward pass)
# --------------------------------------------------------------------------
def prepare_params(params, low_rank_dim):
    """Pad the low-rank dim to Rp (multiple of 128 lanes), fuse q|k|v, fold
    the 1/sqrt(R) scale into W_q/b_q, and cast weights to bf16.  Do this once
    per model, not per forward pass."""
    R = low_rank_dim
    Rp = _round_up(max(R, 1), 128)
    scale = float(R) ** -0.5
    f32 = jnp.float32

    def pad_r(w, b, s):
        w = jnp.pad(w.astype(f32) * s, ((0, 0), (0, Rp - R)))
        b = jnp.pad(b.astype(f32) * s, ((0, 0), (0, Rp - R)))
        return w, b

    wq, bq = pad_r(params["wq"], params["bq"], scale)   # scale folded into Q
    wk, bk = pad_r(params["wk"], params["bk"], 1.0)
    wv, bv = pad_r(params["wv"], params["bv"], 1.0)

    wqkv = jnp.concatenate([wq, wk, wv], axis=1).astype(jnp.bfloat16)  # (E,3Rp)
    bqkv = jnp.concatenate([bq, bk, bv], axis=1)                       # (1,3Rp)
    wo = jnp.pad(params["wo"].astype(f32),
                 ((0, Rp - R), (0, 0))).astype(jnp.bfloat16)           # (Rp,E)
    bo = params["bo"].astype(f32)                                      # (1,E)

    return dict(wqkv=wqkv, bqkv=bqkv, wo=wo, bo=bo,
                rp=Rp, low_rank_dim=R)


# --------------------------------------------------------------------------
# Forward pass
# --------------------------------------------------------------------------
def low_rank_self_attention(x, prepared, block_b=None):
    """x: (B, S, E) float32.  prepared: output of prepare_params()."""
    B, S, E = x.shape
    Rp = prepared["rp"]
    R = prepared["low_rank_dim"]
    wqkv, bqkv = prepared["wqkv"], prepared["bqkv"]
    wo, bo = prepared["wo"], prepared["bo"]

    vmem_limit = _vmem_limit_bytes()
    budget = int(vmem_limit * 0.9)

    if block_b is None:
        bt = _choose_block_b(B, S, E, Rp, budget)
    else:
        bt = block_b
        assert B % bt == 0, "block_b must divide the batch size"
        assert _step_vmem_bytes(bt, S, E, Rp) <= vmem_limit, (
            "explicit block_b exceeds the per-step VMEM budget")

    kernel = functools.partial(_attn_kernel, rp=Rp)
    full = lambda shape: pl.BlockSpec(shape, lambda b: (0, 0))

    flops = 2 * B * S * (3 * E * Rp + 2 * S * Rp + Rp * E)
    bytes_accessed = (4 * 2 * B * S * E                       # x read + out write
                      + 2 * (int(wqkv.size) + int(wo.size))   # bf16 weights
                      + 4 * (int(bqkv.size) + int(bo.size)))  # f32 biases
    cost = pl.CostEstimate(flops=int(flops), transcendentals=int(B * S * S),
                           bytes_accessed=int(bytes_accessed))

    return pl.pallas_call(
        kernel,
        out_shape=jax.ShapeDtypeStruct((B, S, E), x.dtype),
        grid_spec=pltpu.PrefetchScalarGridSpec(
            num_scalar_prefetch=0,
            grid=(B // bt,),
            in_specs=[
                pl.BlockSpec((bt, S, E), lambda b: (b, 0, 0)),  # x
                full((E, 3 * Rp)), full((1, 3 * Rp)),           # fused QKV proj
                full((Rp, E)), full((1, E)),                    # out proj
            ],
            out_specs=pl.BlockSpec((bt, S, E), lambda b: (b, 0, 0)),
            scratch_shapes=[
                pltpu.VMEM((bt, S, 3 * Rp), jnp.bfloat16),      # qkv scratch
                pltpu.VMEM((bt, S, Rp), jnp.bfloat16),          # attn scratch
            ],
        ),
        compiler_params=pltpu.CompilerParams(
            dimension_semantics=("parallel",),
            vmem_limit_bytes=vmem_limit),
        cost_estimate=cost,
    )(x, wqkv, bqkv, wo, bo)


# --------------------------------------------------------------------------
# Synthetic params + plain-JAX reference
# --------------------------------------------------------------------------
def init_params(key, embed_dim, low_rank_dim):
    """Deterministic synthetic parameters (PyTorch Linear shapes, pre-transposed)."""
    ks = jax.random.split(key, 8)

    def lin(kw, kb, fan_in, fan_out):
        bound = 1.0 / (fan_in ** 0.5)
        w = jax.random.uniform(kw, (fan_in, fan_out), jnp.float32, -bound, bound)
        b = jax.random.uniform(kb, (1, fan_out), jnp.float32, -bound, bound)
        return w, b

    wq, bq = lin(ks[0], ks[1], embed_dim, low_rank_dim)
    wk, bk = lin(ks[2], ks[3], embed_dim, low_rank_dim)
    wv, bv = lin(ks[4], ks[5], embed_dim, low_rank_dim)
    wo, bo = lin(ks[6], ks[7], low_rank_dim, embed_dim)
    return dict(wq=wq, bq=bq, wk=wk, bk=bk, wv=wv, bv=bv, wo=wo, bo=bo)


def reference(x, p, low_rank_dim):
    """Plain-JAX f32 reference of the PyTorch forward (eval mode), unpadded."""
    scale = float(low_rank_dim) ** -0.5
    q = x @ p["wq"] + p["bq"][0]
    k = x @ p["wk"] + p["bk"][0]
    v = x @ p["wv"] + p["bv"][0]
    s = jnp.einsum("bqr,bkr->bqk", q, k) * scale
    probs = jax.nn.softmax(s, axis=-1)
    o = jnp.einsum("bqk,bkr->bqr", probs, v)
    return o @ p["wo"] + p["bo"][0]


if __name__ == "__main__":
    B, S, E, R = 2, 8, 32, 16
    key = jax.random.PRNGKey(0)
    kx, kp = jax.random.split(key)
    x = jax.random.normal(kx, (B, S, E), jnp.float32)
    params = init_params(kp, E, R)

    prepared = prepare_params(params, R)           # one-time weight prep
    out = low_rank_self_attention(x, prepared)
    out = jax.block_until_ready(out)

    ref = reference(x, params, R)
    assert out.shape == (B, S, E)
    # Tolerance accounts for bf16 MXU operands (f32 accumulation) and the
    # approximate EUP reciprocal in the softmax denominator.
    err = float(jnp.max(jnp.abs(out - ref)))
    assert jnp.allclose(out, ref, atol=3e-2, rtol=3e-2), (
        f"mismatch vs reference, max abs err = {err}")
    print("KERNEL_OK")
</pallas_src>

<mosaic_0001>
module attributes {stable_mosaic.version = 11 : i64} {
  func.func @_attn_kernel(%arg0: i32, %arg1: memref<1x8x32xf32, #tpu.memory_space<vmem>>, %arg2: memref<32x384xbf16, #tpu.memory_space<vmem>>, %arg3: memref<1x384xf32, #tpu.memory_space<vmem>>, %arg4: memref<128x32xbf16, #tpu.memory_space<vmem>>, %arg5: memref<1x32xf32, #tpu.memory_space<vmem>>, %arg6: memref<1x8x32xf32, #tpu.memory_space<vmem>>, %arg7: memref<1x8x384xbf16, #tpu.memory_space<vmem>>, %arg8: memref<1x8x128xbf16, #tpu.memory_space<vmem>>) attributes {dimension_semantics = [#tpu.dimension_semantics<parallel>], iteration_bounds = array<i64: 2>, scalar_prefetch = 0 : i64, scratch_operands = 2 : i64, tpu.core_type = #tpu.core_type<tc>, window_params = [{transform_indices = @transform_0, window_bounds = array<i64: 1, 8, 32>}, {pipeline_mode = #tpu.pipeline_mode<synchronous>, transform_indices = @transform_1, window_bounds = array<i64: 32, 384>}, {pipeline_mode = #tpu.pipeline_mode<synchronous>, transform_indices = @transform_2, window_bounds = array<i64: 1, 384>}, {pipeline_mode = #tpu.pipeline_mode<synchronous>, transform_indices = @transform_3, window_bounds = array<i64: 128, 32>}, {pipeline_mode = #tpu.pipeline_mode<synchronous>, transform_indices = @transform_4, window_bounds = array<i64: 1, 32>}, {transform_indices = @transform_5, window_bounds = array<i64: 1, 8, 32>}]} {
    %c0 = arith.constant 0 : index
    %c0_0 = arith.constant 0 : index
    %c0_1 = arith.constant 0 : index
    %0 = vector.load %arg1[%c0, %c0_0, %c0_1] : memref<1x8x32xf32, #tpu.memory_space<vmem>>, vector<1x8x32xf32>
    %1 = vector.shape_cast %0 : vector<1x8x32xf32> to vector<8x32xf32>
    %2 = arith.truncf %1 : vector<8x32xf32> to vector<8x32xbf16>
    %c0_2 = arith.constant 0 : index
    %c0_3 = arith.constant 0 : index
    %3 = vector.load %arg2[%c0_2, %c0_3] : memref<32x384xbf16, #tpu.memory_space<vmem>>, vector<32x384xbf16>
    %cst = arith.constant dense<0.000000e+00> : vector<8x384xf32>
    %4 = tpu.matmul %2, %3, %cst {dimension_numbers = #tpu.dot_dimension_numbers<[1], [0], [0], [1], [0, 0, 1, 1], [], []>} : vector<8x32xbf16>, vector<32x384xbf16>, vector<8x384xf32> -> vector<8x384xf32>
    %c0_4 = arith.constant 0 : index
    %c0_5 = arith.constant 0 : index
    %5 = vector.load %arg3[%c0_4, %c0_5] : memref<1x384xf32, #tpu.memory_space<vmem>>, vector<1x384xf32>
    %6 = vector.broadcast %5 : vector<1x384xf32> to vector<8x384xf32>
    %7 = arith.addf %4, %6 : vector<8x384xf32>
    %8 = vector.shape_cast %7 : vector<8x384xf32> to vector<1x8x384xf32>
    %9 = arith.truncf %8 : vector<1x8x384xf32> to vector<1x8x384xbf16>
    %c0_6 = arith.constant 0 : index
    %c0_7 = arith.constant 0 : index
    %c0_8 = arith.constant 0 : index
    %10 = vector.load %arg7[%c0_6, %c0_7, %c0_8] : memref<1x8x384xbf16, #tpu.memory_space<vmem>>, vector<1x8x384xbf16>
    tpu.vector_store %arg7[%c0_6, %c0_7, %c0_8], %9 {strides = array<i32>} : memref<1x8x384xbf16, #tpu.memory_space<vmem>>, vector<1x8x384xbf16>,
    %c0_i32 = arith.constant 0 : i32
    %c1_i32 = arith.constant 1 : i32
    %11 = arith.muli %c0_i32, %c1_i32 : i32
    %c0_i32_9 = arith.constant 0 : i32
    %12 = arith.addi %c0_i32_9, %11 : i32
    %13 = arith.index_cast %12 : i32 to index
    %c0_10 = arith.constant 0 : index
    %c0_11 = arith.constant 0 : index
    %14 = vector.load %arg7[%13, %c0_10, %c0_11] : memref<1x8x384xbf16, #tpu.memory_space<vmem>>, vector<1x8x384xbf16>
    %15 = vector.shape_cast %14 : vector<1x8x384xbf16> to vector<8x384xbf16>
    %16 = vector.extract_strided_slice %15 {offsets = [0, 0], sizes = [8, 128], strides = [1, 1]} : vector<8x384xbf16> to vector<8x128xbf16>
    %17 = vector.extract_strided_slice %15 {offsets = [0, 128], sizes = [8, 128], strides = [1, 1]} : vector<8x384xbf16> to vector<8x128xbf16>
    %18 = vector.extract_strided_slice %15 {offsets = [0, 256], sizes = [8, 128], strides = [1, 1]} : vector<8x384xbf16> to vector<8x128xbf16>
    %cst_12 = arith.constant dense<0.000000e+00> : vector<8x8xf32>
    %19 = tpu.matmul %16, %17, %cst_12 {dimension_numbers = #tpu.dot_dimension_numbers<[1], [1], [0], [0], [0, 0, 1, 0], [], []>} : vector<8x128xbf16>, vector<8x128xbf16>, vector<8x8xf32> -> vector<8x8xf32>
    %cst_13 = arith.constant dense<0xFF800000> : vector<8xf32>
    %20 = vector.multi_reduction <maximumf>, %19, %cst_13 [1] : vector<8x8xf32> to vector<8xf32>
    %21 = vector.shape_cast %20 : vector<8xf32> to vector<8x1xf32>
    %22 = vector.broadcast %21 : vector<8x1xf32> to vector<8x8xf32>
    %23 = arith.subf %19, %22 : vector<8x8xf32>
    %24 = math.exp %23 : vector<8x8xf32>
    %cst_14 = arith.constant dense<0.000000e+00> : vector<8xf32>
    %25 = vector.multi_reduction <add>, %24, %cst_14 [1] : vector<8x8xf32> to vector<8xf32>
    %26 = vector.shape_cast %25 : vector<8xf32> to vector<8x1xf32>
    %27 = tpu.reciprocal %26 {approx = true} : vector<8x1xf32> -> vector<8x1xf32>
    %28 = vector.broadcast %27 : vector<8x1xf32> to vector<8x8xf32>
    %29 = arith.mulf %24, %28 : vector<8x8xf32>
    %30 = arith.truncf %29 : vector<8x8xf32> to vector<8x8xbf16>
    %cst_15 = arith.constant dense<0.000000e+00> : vector<8x128xf32>
    %31 = tpu.matmul %30, %18, %cst_15 {dimension_numbers = #tpu.dot_dimension_numbers<[1], [0], [0], [1], [0, 0, 1, 1], [], []>} : vector<8x8xbf16>, vector<8x128xbf16>, vector<8x128xf32> -> vector<8x128xf32>
    %32 = arith.truncf %31 : vector<8x128xf32> to vector<8x128xbf16>
    %33 = arith.index_cast %12 : i32 to index
    %c0_16 = arith.constant 0 : index
    %c0_17 = arith.constant 0 : index
    %34 = vector.load %arg8[%33, %c0_16, %c0_17] : memref<1x8x128xbf16, #tpu.memory_space<vmem>>, vector<1x8x128xbf16>
    %35 = vector.shape_cast %34 : vector<1x8x128xbf16> to vector<8x128xbf16>
    %36 = vector.shape_cast %32 : vector<8x128xbf16> to vector<1x8x128xbf16>
    tpu.vector_store %arg8[%33, %c0_16, %c0_17], %36 {strides = array<i32>} : memref<1x8x128xbf16, #tpu.memory_space<vmem>>, vector<1x8x128xbf16>,
    %c1_i32_18 = arith.constant 1 : i32
    %c0_19 = arith.constant 0 : index
    %c0_20 = arith.constant 0 : index
    %c0_21 = arith.constant 0 : index
    %37 = vector.load %arg8[%c0_19, %c0_20, %c0_21] : memref<1x8x128xbf16, #tpu.memory_space<vmem>>, vector<1x8x128xbf16>
    %38 = vector.shape_cast %37 : vector<1x8x128xbf16> to vector<8x128xbf16>
    %c0_22 = arith.constant 0 : index
    %c0_23 = arith.constant 0 : index
    %39 = vector.load %arg4[%c0_22, %c0_23] : memref<128x32xbf16, #tpu.memory_space<vmem>>, vector<128x32xbf16>
    %cst_24 = arith.constant dense<0.000000e+00> : vector<8x32xf32>
    %40 = tpu.matmul %38, %39, %cst_24 {dimension_numbers = #tpu.dot_dimension_numbers<[1], [0], [0], [1], [0, 0, 1, 1], [], []>} : vector<8x128xbf16>, vector<128x32xbf16>, vector<8x32xf32> -> vector<8x32xf32>
    %c0_25 = arith.constant 0 : index
    %c0_26 = arith.constant 0 : index
    %41 = vector.load %arg5[%c0_25, %c0_26] : memref<1x32xf32, #tpu.memory_space<vmem>>, vector<1x32xf32>
    %42 = vector.broadcast %41 : vector<1x32xf32> to vector<8x32xf32>
    %43 = arith.addf %40, %42 : vector<8x32xf32>
    %44 = vector.shape_cast %43 : vector<8x32xf32> to vector<1x8x32xf32>
    %c0_27 = arith.constant 0 : index
    %c0_28 = arith.constant 0 : index
    %c0_29 = arith.constant 0 : index
    %45 = vector.load %arg6[%c0_27, %c0_28, %c0_29] : memref<1x8x32xf32, #tpu.memory_space<vmem>>, vector<1x8x32xf32>
    tpu.vector_store %arg6[%c0_27, %c0_28, %c0_29], %44 {strides = array<i32>} : memref<1x8x32xf32, #tpu.memory_space<vmem>>, vector<1x8x32xf32>,
    return
  }
  func.func @transform_0(%arg0: i32) -> (i32, i32, i32) {
    %c0_i32 = arith.constant 0 : i32
    %c0_i32_0 = arith.constant 0 : i32
    %c0_i32_1 = arith.constant 0 : i32
    return %arg0, %c0_i32, %c0_i32_0 : i32, i32, i32
  }
  func.func @transform_1(%arg0: i32) -> (i32, i32) {
    %c0_i32 = arith.constant 0 : i32
    %c0_i32_0 = arith.constant 0 : i32
    %c0_i32_1 = arith.constant 0 : i32
    return %c0_i32, %c0_i32_0 : i32, i32
  }
  func.func @transform_2(%arg0: i32) -> (i32, i32) {
    %c0_i32 = arith.constant 0 : i32
    %c0_i32_0 = arith.constant 0 : i32
    %c0_i32_1 = arith.constant 0 : i32
    return %c0_i32, %c0_i32_0 : i32, i32
  }
  func.func @transform_3(%arg0: i32) -> (i32, i32) {
    %c0_i32 = arith.constant 0 : i32
    %c0_i32_0 = arith.constant 0 : i32
    %c0_i32_1 = arith.constant 0 : i32
    return %c0_i32, %c0_i32_0 : i32, i32
  }
  func.func @transform_4(%arg0: i32) -> (i32, i32) {
    %c0_i32 = arith.constant 0 : i32
    %c0_i32_0 = arith.constant 0 : i32
    %c0_i32_1 = arith.constant 0 : i32
    return %c0_i32, %c0_i32_0 : i32, i32
  }
  func.func @transform_5(%arg0: i32) -> (i32, i32, i32) {
    %c0_i32 = arith.constant 0 : i32
    %c0_i32_0 = arith.constant 0 : i32
    %c0_i32_1 = arith.constant 0 : i32
    return %arg0, %c0_i32, %c0_i32_0 : i32, i32, i32
  }
}

</mosaic_0001>

<bundles_post_ra>
// kernel: tpu_custom_call.1
= control target key start
LH: loop header
LB: loop body
LE: loop exit
PB: predicated region body
PF: predicated region fallthrough
CT: control target
= control target key end

     0   :  { %10 = vsyncpa [#allocation5], 0  ;;  %s1098_s0 = inlined_call_operand.vmem [shape: f32[2,8,32], index: 0, kind: input, shape index: {}]   ;;  %s1099_s1 = inlined_call_operand.vmem [shape: bf16[32,384], index: 1, kind: input, shape index: {}]   ;;  %s1100_s2 = inlined_call_operand.vmem [shape: f32[1,384], index: 2, kind: input, shape index: {}]   ;;  %s1101_s3 = inlined_call_operand.vmem [shape: bf16[128,32], index: 3, kind: input, shape index: {}]   ;;  %s1102_s4 = inlined_call_operand.vmem [shape: f32[1,32], index: 4, kind: input, shape index: {}]   ;;  %s1103_s5 = inlined_call_operand.hbm [shape: f32[2,8,32], index: 5, kind: output, shape index: {}]  }
   0x1   :  { %12 = vsyncpa [#allocation5 + $0x1], 0  ;;  %s924_s18 = smov 0   ;;  %s926_s19 = smov 0  }
   0x2   :  { %s928_s20 = smov 0   ;;  %s930_s21 = smov 0  }
   0x3 LB: > { %s945_s22 = sadd.s32 4294967295, %s888_s21   ;;  %s674_s23 = sadd.s32 4294967294, %s888_s21   ;;  %s888_s21 = sphi %s930_s21, %s1109_s21   ;;  %s884_s20 = sphi %s928_s20, %s1108_s20   ;;  %s880_s19 = sphi %s926_s19, %s1107_s19   ;;  %s876_s18 = sphi %s924_s18, %s1106_s18  }
   0x4   : > { %s949_s24 = sadd.s32 1, %s888_s21   ;;  %s135_s25 = sadd.s32 1, %s884_s20 }
   0x5   : > { %s132_s26 = ssub.s32 %s888_s21, %s949_s24  ;;  %p145_p0 = scmp.ne.s32.totalorder %s884_s20, %s880_s19 }
   0x6   : > { %p133_p1 = scmp.eq.s32.totalorder %s132_s26, 0  ;;  %p146_p2 = scmp.eq.s32.totalorder %s945_s22, 1 }
   0x7   : > { %p151_p3 = scmp.ne.s32.totalorder %s880_s19, %s876_s18  ;;  %p152_p4 = scmp.eq.s32.totalorder %s674_s23, 1 }
   0x8   : > { %s960_s27 = scalar_select %p133_p1, %s884_s20, %s135_s25  }
   0x9   : > { %p962_p5 = por %p146_p2, %p145_p0  ;;  %p966_p6 = por %p152_p4, %p151_p3 }
   0xa   : > { %p677_p7 = scmp.ge.s32.totalorder %s888_s21, 1  ;;  %p189_p8 = scmp.lt.s32.totalorder %s888_s21, 3 }
   0xc   : > { %p190_p9 = pnand %p677_p7, %p189_p8 }
   0xd   : > { %v805_v0 = vld [vmem:[%s1099_s1 + $0x4] ss:$12 sps:$4 sm:$0xff] (!%p190_p9)   ;;  %p216_p10 = scmp.lt.s32.totalorder (!%p190_p9), %s945_s22, 1  ;;  %v807_v1 = vld [vmem:[%s1099_s1] ss:$12 sps:$4 sm:$0xff] (!%p190_p9)   ;;  %v890_v2 = vmov (!%p190_p9), 0   ;;  %v233_v10 = vlaneseq (!%p190_p9) }
   0xe   : > { %193 = sbr.rel (%p190_p9) target bundleno = 1230 (0x4ce), region = 40  ;;  %316 = vmatprep.mubr.bf16.mxu1 (!%p190_p9), %v890_v2  ;;  %284 = vmatprep.subr.bf16.mxu1 (!%p190_p9), %v805_v0  ;;  %v808_v3 = vld [vmem:[%s1099_s1 + $0x1c] ss:$12 sps:$4 sm:$0xff] (!%p190_p9)   ;;  %v810_v4 = vld [vmem:[%s1099_s1 + $0x18] ss:$12 sps:$4 sm:$0xff] (!%p190_p9)   ;;  %vm280_vm0 = vcmask (!%p190_p9), 261120  }
   0xf   : > { %285 = vmatpush1.bf16.msra.mxu1 (!%p190_p9), %v807_v1  ;;  %v811_v7 = vld [vmem:[%s1099_s1 + $0x8] ss:$12 sps:$4 sm:$0xff] (!%p190_p9)   ;;  %v891_v8 = vmov (!%p190_p9), 0.0   ;;  %v812_v9 = vld [vmem:[%s1099_s1 + $0x20] ss:$12 sps:$4 sm:$0xff] (!%p190_p9)   ;;  %vm892_vm1 = vmmov (!%p190_p9), 0  }
  0x10   : > { %286 = vmatprep.subr.bf16.mxu1 (!%p190_p9), %v808_v3  ;;  %743 = vmatprep.subr.bf16.mxu0 (!%p190_p9), %v891_v8  ;;  %v234_v11 = vshrl.u32 (!%p190_p9), %v233_v10, 7  ;;  %v231_v13 = vld [vmem:[%s1100_s2] sm:$0x7] (!%p190_p9)  ;;  %vm442_vm2 = vcmask (!%p190_p9), 1043456   ;;  %vm426_vm3 = vcmask (!%p190_p9), 64512   ;;  %v814_v46 = vld [vmem:[%s1101_s3 + $0x8] sm:$0xff] (!%p190_p9)  }
  0x11   : > { %759 = vmatprep.mubr.msk.bf16.mxu0 (!%p190_p9), %vm892_vm1, %v891_v8  ;;  %v813_v45 = vld [vmem:[%s1101_s3] sm:$0xff] (!%p190_p9)   ;;  %v815_v47 = vld [vmem:[%s1101_s3 + $0x10] sm:$0xff] (!%p190_p9)   ;;  %v816_v48 = vld [vmem:[%s1101_s3 + $0x18] sm:$0xff] (!%p190_p9)   ;;  %s213_s8 = sand.u32 (!%p190_p9), 1, %s880_s19   ;;  %s702_s12 = sshll.u32 (!%p190_p9), %s945_s22, 7 }
  0x12   : > { %v235_v12 = vsub.s32 (!%p190_p9), 0, %v234_v11  ;;  %v239_v14 = vsub.s32 (!%p190_p9), 1, %v234_v11  ;;  %v243_v25 = vsub.s32 (!%p190_p9), 2, %v234_v11  ;;  %744 = vmatpush3.bf16.msra.mxu0 (!%p190_p9), %v813_v45  ;;  %v817_v49 = vld [vmem:[%s1101_s3 + $0x20] sm:$0xff] (!%p190_p9)   ;;  %v818_v54 = vld [vmem:[%s1101_s3 + $0x28] sm:$0xff] (!%p190_p9)   ;;  %v819_v55 = vld [vmem:[%s1101_s3 + $0x30] sm:$0xff] (!%p190_p9)  }
  0x13   : > { %287 = vmatpush1.bf16.msra.mxu1 (!%p190_p9), %v810_v4  ;;  %745 = vmatprep.subr.bf16.mxu0 (!%p190_p9), %v891_v8  ;;  %v820_v56 = vld [vmem:[%s1101_s3 + $0x38] sm:$0xff] (!%p190_p9)   ;;  %s678_s9 = sshll.u32 (!%p190_p9), %s213_s8, 3  ;;  %v692_v63 = vld [vmem:[%s1102_s4] ss:$0 sm:$0xff] (!%p190_p9)  ;;  %s893_s25 = smov (!%p190_p9), [#allocation4]  }
  0x14   : > { %723 = vmatprep.subr.bf16.mxu1 (!%p190_p9), %v891_v8  ;;  %v236_v15 = vrot.slane (!%p190_p9), %v231_v13, %v235_v12  ;;  %v240_v16 = vrot.slane (!%p190_p9), %v231_v13, %v239_v14  ;;  %v244_v26 = vrot.slane (!%p190_p9), %v231_v13, %v243_v25  ;;  %s215_s13 = scalar_lea.vmem (!%p190_p9), [#allocation4], %s678_s9  ;;  %s830_s26 = sshll.u32 (!%p190_p9), %s893_s25, 4  ;;  %s831_s26 = int_to_ptr.vmem [resolvable:$false] %s830_s26 }
  0x15   : > { %s217_s11 = scalar_select %p216_p10, %s945_s22, 1 }
  0x16   : > { %746 = vmatpush3.bf16.msra.mxu0 %v814_v46  ;;  %s602_s22 = scalar_lea.sflag [#allocation5], %s213_s8  ;;  %s832_s30 = scalar_lea.vmem %s831_s26, 256 }
  0x17   : > { %s679_s14 = sshll.u32 %s217_s11, 3  ;;  %747 = vmatprep.subr.bf16.mxu0 %v891_v8 }
  0x18   : > { %s219_s17 = scalar_lea.vmem %s1098_s0, %s679_s14  ;;  %s615_s14 = sshll.u32 %s215_s13, 4  ;;  %s1057_s14 = int_to_ptr.vmem [resolvable:$true] %s615_s14 }
  0x19   : > { %v221_v5 = vld [vmem:[%s219_s17] sm:$0xff]  ;;  %s1055_s17 = scalar_lea.hbm %s1103_s5, %s702_s12  ;;  %s826_s23 = scalar_lea.vmem %s1057_s14, 128 }
  0x1a   : > { %v222_v6 = vpack.c.bf16 %v221_v5, %v221_v5  ;;  %748 = vmatpush3.bf16.msra.mxu0 %v815_v47  ;;  %p827_p11 = scmp.ne.s32.totalorder %s1057_s14, %s826_s23  ;;  %p833_p0 = scmp.lt.s32.totalorder %s1057_s14, %s831_s26 }
  0x1b   : > { %749 = vmatprep.subr.bf16.mxu0 %v891_v8  ;;  %p834_p1 = scmp.lt.s32.totalorder %s832_s30, %s826_s23 }
  0x1c   : > { %686 = vmatmul.mubr.msk.bf16.vlgmr.msra.gmra.mrb[0].mxu1 %vm280_vm0, %v222_v6  ;;  %p828_p12 = pnand %p827_p11, %p962_p5 }
  0x1d   : > { %724 = vmatpush3.bf16.msra.mxu1 %v811_v7  ;;  %727 = vmatprep.mubr.msk.bf16.mxu1 %vm892_vm1, %v891_v8  ;;  %p835_p2 = por %p834_p1, %p833_p0 }
  0x1e   : > { %725 = vmatprep.subr.bf16.mxu1 %v891_v8  ;;  %750 = vmatpush3.bf16.msra.mxu0 %v816_v48  ;;  %p829_p13 = pneg %p828_p12 }
  0x1f   : > { %751 = vmatprep.subr.bf16.mxu0 %v891_v8 }
  0x20   : > { %p836_p3 = pnand %p835_p2, %p829_p13 }
  0x21   : > { %726 = vmatpush3.bf16.msra.mxu1 %v812_v9 }
  0x22   : > { %731 = vmatprep.subr.bf16.mxu1 %v891_v8  ;;  %752 = vmatpush3.bf16.msra.mxu0 %v817_v49 }
  0x23   : > { %753 = vmatprep.subr.bf16.mxu0 %v891_v8 }
  0x24   : > { %728 = vmatmul.mubr.msk.bf16.vlgmr.msra.gmra.mrb[4].mxu1 %vm280_vm0, %v222_v6 }
  0x25   : > { %733 = vmatprep.mubr.msk.bf16.mxu1 %vm892_vm1, %v891_v8 }
  0x26   : > { %754 = vmatpush3.bf16.msra.mxu0 %v818_v54 }
  0x27   : > { %755 = vmatprep.subr.bf16.mxu0 %v891_v8 }
  0x2a   : > { %756 = vmatpush3.bf16.msra.mxu0 %v819_v55 }
  0x2b   : > { %757 = vmatprep.subr.bf16.mxu0 %v891_v8 }
  0x2e   : > { %758 = vmatpush3.bf16.msra.mxu0 %v820_v56 }
  0xef   : > { %v318_v17 = vpop.f32.mrb[0].mxu1 }
  0xf0   : > { %v319_v18 = vadd.f32 %v318_v17, %v236_v15  ;;  %v320_v19 = vpop.f32.mrb[1].mxu1 }
  0xf1   : > { %v321_v20 = vadd.f32 %v320_v19, %v240_v16  ;;  %v322_v21 = vpop.f32.mrb[2].mxu1 }
  0xf2   : > { %v323_v22 = vpop.f32.mrb[3].mxu1 }
  0xf3   : > { %v705_v23 = vpack.c.bf16 %v321_v20, %v319_v18  ;;  %v825_v24 = vpack.c.bf16 %v321_v20, %v321_v20 }
  0xf5   : > { %732 = vmatpush3.bf16.xpose.msra.mxu1 %v825_v24 }
  0xf6   : > { %737 = vmatprep.subr.bf16.mxu1 %v891_v8 }
  0xf7   : > { %v359_v27 = vpop.f32.mrb[4].mxu1 }
  0xf8   : > { %v360_v28 = vadd.f32 %v359_v27, %v244_v26  ;;  %v729_v29 = vpop.f32.mrb[5].mxu1 }
  0xf9   : > { %v362_v30 = vpop.f32.mrb[6].mxu1 }
  0xfa   : > { %v706_v31 = vpack.c.bf16 %v360_v28, %v360_v28  ;;  %v730_v32 = vpop.f32.mrb[7].mxu1 }
  0xfc   : > { %734 = vmatmul.mubr.bf16.vlgmr.msra.gmra.mrb[8].mxu1 %v705_v23  ;;  %379 = vst [vmem:[#allocation2 + $0x8] sm:$0xf] %v706_v31 }
  0xfd   : > { %739 = vmatprep.mubr.msk.bf16.mxu1 %vm892_vm1, %v891_v8 }
 0x103   : > { %v381_v33 = vld [vmem:[#allocation2 + $0x8] sm:$0xf] }
 0x104   : > { %v444_v34 = vsel %vm442_vm2, %v381_v33, 0 }
 0x105   : > { %738 = vmatpush3.bf16.msra.mxu1 %v444_v34 }
 0x1cf   : > { %v420_v35 = vpop.f32.mrb[8].mxu1 }
 0x1d0   : > { %v735_v36 = vpop.f32.mrb[9].mxu1  ;;  %v427_v37 = vsel %vm426_vm3, %v420_v35, -inf }
 0x1d1   : > { %428 = vmax.xlane.f32.xlu0 %v427_v37  ;;  %v423_v38 = vpop.f32.mrb[10].mxu1 }
 0x1d2   : > { %v736_v39 = vpop.f32.mrb[11].mxu1 }
 0x25e   : > { %v429_v40 = vpop.xlane.xlu0 %428 }
 0x25f   : > { %v430_v41 = vsub.f32 %v420_v35, %v429_v40 }
 0x261   : > { %v431_v42 = vmul.f32 1.442695, %v430_v41 }
 0x263   : > { %821 = vpow2.f32 %v431_v42 }
 0x26d   : > { %v822_v43 = vpop.eup %821 }
 0x26e   : > { %v433_v44 = vsel %vm426_vm3, %v822_v43, 0.0 }
 0x26f   : > { %434 = vadd.xlane.f32.xlu0 %v433_v44 }
 0x2fc   : > { %v435_v50 = vpop.xlane.xlu0 %434 }
 0x2fd   : > { %823 = vrcp.f32 %v435_v50 }
 0x307   : > { %v824_v51 = vpop.eup %823 }
 0x308   : > { %v437_v52 = vmul.f32 %v824_v51, %v822_v43 }
 0x30a   : > { %v438_v53 = vpack.c.bf16 %v437_v52, %v437_v52 }
 0x30c   : > { %740 = vmatmul.mubr.msk.bf16.vlgmr.msra.gmra.mrb[12].mxu1 %vm426_vm3, %v438_v53 }
 0x3df   : > { %v480_v57 = vpop.f32.mrb[12].mxu1 }
 0x3e0   : > { %v486_v58 = vpack.c.bf16 %v480_v57, %v480_v57  ;;  %v741_v59 = vpop.f32.mrb[13].mxu1 }
 0x3e1   : > { %v483_v60 = vpop.f32.mrb[14].mxu1 }
 0x3e2   : > { %487 = vst [vmem:[#allocation3] sm:$0xf] %v486_v58  ;;  %v742_v61 = vpop.f32.mrb[15].mxu1 }
 0x3e9   : > { %v488_v62 = vld [vmem:[#allocation3] sm:$0xf] }
 0x3ea   : > { %760 = vmatmul.mubr.bf16.vlgmr.msra.gmra.mrb[0].mxu0 %v488_v62 }
 0x4bd   : > { %v594_v0 = vpop.f32.mrb[0].mxu0 }
 0x4be   : > { %v595_v1 = vadd.f32 %v692_v63, %v594_v0  ;;  %v761_v2 = vpop.f32.mrb[1].mxu0 }
 0x4bf   : > { %v597_v3 = vpop.f32.mrb[2].mxu0 }
 0x4c0   : > { %v762_v4 = vpop.f32.mrb[3].mxu0  ;;  %600 = vst.msk [vmem:[%s215_s13] sm:$0xff] %vm280_vm0, %v595_v1 }
 0x4c1   : > { %839 = shalt.err (!%p836_p3)
}
 0x4c2   : > { %s840_s6 = scalar_lea.hbm %s1055_s17, 128  ;;  %s844_s9 = scalar_lea.hbm %s1103_s5, 256 }
 0x4c3   : > { %p841_p4 = scmp.ne.s32.totalorder %s1055_s17, %s840_s6  ;;  %p845_p9 = scmp.lt.u32.totalorder %s1055_s17, %s1103_s5 }
 0x4c4   : > { %p846_p10 = scmp.lt.u32.totalorder %s844_s9, %s840_s6  ;;  %p848_p12 = scmp.lt.u32.totalorder %s840_s6, %s1055_s17 }
 0x4c5   : > { %p842_p7 = pnand %p841_p4, %p962_p5 }
 0x4c6   : > { %p847_p11 = por %p846_p10, %p845_p9 }
 0x4c7   : > { %p843_p8 = pneg %p842_p7 }
 0x4c8   : > { %p849_p13 = por %p848_p12, %p847_p11 }
 0x4ca   : > { %p850_p0 = pnand %p849_p13, %p843_p8 }
 0x4cc   : > { %853 = shalt.err (!%p850_p0)
}
 0x4cd   : > { %763 = dma.vmem_to_hbm [thread:$0]  (%p962_p5), %s1057_s14, 128, %s1055_s17, %s602_s22  }
 0x4ce PF: > { %p769_p1 = scmp.ge.s32.totalorder %s888_s21, 2  ;;  %s627_s12 = sand.u32 1, %s876_s18  }
 0x4cf   : > { %s628_s13 = scalar_lea.sflag [#allocation5], %s627_s12 }
 0x4d0   : > { %p766_p2 = pnand %p769_p1, %p966_p6 }
 0x4d2   : > { %871 = dma.done.wait (!%p766_p2), %s628_s13, 128  }
 0x4d3   : > { %873 = vsyncadd (!%p766_p2), %s628_s13, 4294967168  ;;  %p15_p3 = scmp.ge.s32.totalorder %s949_s24, 4   ;;  %s1106_s18 = smov %s880_s19 }
 0x4d4   : > { %s1107_s19 = smov %s884_s20  ;;  %s1108_s20 = smov %s960_s27 }
 0x4d5   : > { %s1109_s21 = smov %s949_s24  ;;  %17 = sbr.rel (!%p15_p3) target bundleno = 3 (0x3), region = 75 }
 0x4dc   :  { %633 = vsyncpa [#allocation5], 1 }
 0x4dd   :  { %635 = vsyncpa [#allocation5 + $0x1], 1 }

</bundles_post_ra>
